<compile_context>
chip_gen: v6e
topology: v6e:2x2x1
jax: 0.10.0
libtpu: 0.0.40
codegen_flags: <defaults>
</compile_context>

<pallas_src>
import jax
import jax.numpy as jnp
from jax.experimental import pallas as pl
from jax.experimental.pallas import tpu as pltpu


_LANE = 128
_MAX_TM = 2048                 # cap on the M tile (perf-review sweep range)
_RESIDENT_N_MAX = 1024         # keep the full circulant resident up to this N
_TILE_NK = 512                 # tn/tk tile when N is tiled (large-N / v7x path)
_VMEM_TILE_BUDGET = 28 * 1024 * 1024


def _round_up(x, m):
    return ((x + m - 1) // m) * m


def _circ_conv_kernel(c_ref, x_ref, o_ref, acc_ref):
    """One (tn, tm) output tile: accumulate C-tile @ x-tile over the k axis."""

    @pl.when(pl.program_id(2) == 0)
    def _init():
        acc_ref[...] = jnp.zeros_like(acc_ref)

    acc_ref[...] += jnp.dot(
        c_ref[...], x_ref[...], preferred_element_type=jnp.float32
    )

    @pl.when(pl.program_id(2) == pl.num_programs(2) - 1)
    def _store():
        o_ref[...] = acc_ref[...].astype(o_ref.dtype)


def _circ_conv_matmul(circ, x2d, use_bfloat16=False):
    """out_T = circ @ x2d ; circ: (N, N), x2d: (N, M) -> (N, M) float32."""
    N, M = x2d.shape
    in_dtype = jnp.bfloat16 if use_bfloat16 else jnp.float32
    itemsize = 2 if use_bfloat16 else 4

    # --- N / K tiling plan ---------------------------------------------------
    if N <= _RESIDENT_N_MAX:
        tn = tk = N                      # full circulant resident, 1 k step
        n_pad = N
    else:
        tn = tk = _TILE_NK               # tile circulant; accumulate over k
        n_pad = _round_up(N, _TILE_NK)
        circ = jnp.pad(circ, ((0, n_pad - N), (0, n_pad - N)))
        x2d = jnp.pad(x2d, ((0, n_pad - N), (0, 0)))

    # --- M tile from a VMEM budget -------------------------------------------
    # per unit of tm: x (double-buffered) + out (double-buffered, f32) + acc (f32)
    per_tm = 2 * tk * itemsize + 3 * tn * 4
    fixed = 2 * tn * tk * itemsize       # circulant block, worst-case 2 buffers
    avail = max(_VMEM_TILE_BUDGET - fixed, per_tm * _LANE)
    tm = max(_LANE, (avail // per_tm) // _LANE * _LANE)
    tm = min(tm, _MAX_TM)
    m_pad = _round_up(M, _LANE)
    tm = min(tm, m_pad)
    # Prefer >= 2 M tiles so the 'parallel' axis can shard across v7x's 2 TCs.
    if pl.cdiv(m_pad, tm) < 2 and m_pad >= 2 * _LANE:
        tm = _round_up(m_pad // 2, _LANE)

    grid = (pl.cdiv(M, tm), n_pad // tn, n_pad // tk)

    est_vmem = fixed + tm * per_tm
    vmem_limit = int(min(max(est_vmem * 3 // 2, 32 * 1024 * 1024),
                         60 * 1024 * 1024))

    cost = pl.CostEstimate(
        flops=2 * M * n_pad * n_pad,
        transcendentals=0,
        bytes_accessed=(n_pad * n_pad + n_pad * M) * itemsize + n_pad * M * 4,
    )

    out = pl.pallas_call(
        _circ_conv_kernel,
        out_shape=jax.ShapeDtypeStruct((n_pad, M), jnp.float32),
        grid_spec=pltpu.PrefetchScalarGridSpec(
            num_scalar_prefetch=0,
            grid=grid,
            in_specs=[
                pl.BlockSpec((tn, tk), lambda mi, ni, ki: (ni, ki)),
                pl.BlockSpec((tk, tm), lambda mi, ni, ki: (ki, mi)),
            ],
            out_specs=pl.BlockSpec((tn, tm), lambda mi, ni, ki: (ni, mi)),
            scratch_shapes=[pltpu.VMEM((tn, tm), jnp.float32)],
        ),
        compiler_params=pltpu.CompilerParams(
            dimension_semantics=("parallel", "parallel", "arbitrary"),
            vmem_limit_bytes=vmem_limit,
        ),
        cost_estimate=cost,
    )(circ.astype(in_dtype), x2d.astype(in_dtype))

    return out[:N] if n_pad != N else out


def convn_fft_layer(input_tensor, kernel, dim, flag_return_real=True,
                    use_bfloat16=False):
    """JAX/Pallas equivalent of convn_fft_layer_torch.forward.

    input_tensor: real ND array (e.g. NCHW), kernel: real 1D array,
    dim: dimension along which to convolve (circular / FFT semantics).
    use_bfloat16: opt-in bf16 MXU path (lower precision, ~2-3x MXU on v6e/v7x).
    """
    ndim = input_tensor.ndim
    if dim < 0:
        dim = ndim - abs(dim)
    N = input_tensor.shape[dim]

    # fftn(kernel, s=N) semantics: truncate to N samples, else zero-pad to N.
    k = kernel.astype(jnp.float32).reshape(-1)
    K = k.shape[0]
    kpad = k[:N] if K >= N else jnp.pad(k, (0, N - K))

    # Circulant C[n, m] = kpad[(n - m) mod N] so out[n] = sum_m C[n, m] x[m].
    # TODO(synk): for repeated calls with a static kernel/N, precompute C once
    # outside the jit hot path (this gather is O(N^2) HBM traffic per call).
    n_idx = jnp.arange(N)
    circ = kpad[(n_idx[:, None] - n_idx[None, :]) % N]          # (N, N) f32

    # Move conv dim to the FRONT, flatten the rest -> (N, M).  The kernel's
    # output last dim is then M (large, lane-dense) rather than N.
    x = jnp.moveaxis(input_tensor.astype(jnp.float32), dim, 0)
    lead_shape = x.shape[1:]
    x2d = x.reshape(N, -1)

    out2d = _circ_conv_matmul(circ, x2d, use_bfloat16=use_bfloat16)

    out = out2d.reshape((N,) + lead_shape)
    out = jnp.moveaxis(out, 0, dim)

    if flag_return_real:
        return out
    # TODO(synk): torch returns complex with ~1e-8 imaginary noise; here the
    # imaginary part is exactly zero for real inputs.
    return out.astype(jnp.complex64)


def _fft_reference(input_tensor, kernel, dim):
    """Pure-JAX FFT reference replicating the torch module semantics."""
    ndim = input_tensor.ndim
    if dim < 0:
        dim = ndim - abs(dim)
    N = input_tensor.shape[dim]
    kernel_fft = jnp.fft.fft(kernel, n=N, axis=-1)
    n_end = ndim - dim - 1
    n_begin = ndim - n_end - 1
    shape = (1,) * n_begin + (N,) + (1,) * n_end
    kernel_fft = kernel_fft.reshape(shape)
    out = jnp.fft.ifft(jnp.fft.fft(input_tensor, axis=dim) * kernel_fft, axis=dim)
    return out.real


if __name__ == "__main__":
    key = jax.random.PRNGKey(0)
    k_x, k_k = jax.random.split(key)

    # Small NCHW input, 1D kernel, convolve along the last (W) dim.
    x = jax.random.normal(k_x, (2, 4, 16, 16), dtype=jnp.float32)
    kernel = jax.random.normal(k_k, (5,), dtype=jnp.float32)
    dim = -1

    out = convn_fft_layer(x, kernel, dim, flag_return_real=True)
    out = jax.block_until_ready(out)

    ref = _fft_reference(x, kernel, dim)
    assert out.shape == x.shape
    assert jnp.allclose(out, ref, atol=1e-4, rtol=1e-4), (
        "mismatch vs FFT reference"
    )

    print("KERNEL_OK")
</pallas_src>

<mosaic_0001>
module attributes {stable_mosaic.version = 11 : i64} {
  func.func @_circ_conv_kernel(%arg0: i32, %arg1: i32, %arg2: i32, %arg3: memref<16x16xf32, #tpu.memory_space<vmem>>, %arg4: memref<16x128xf32, #tpu.memory_space<vmem>>, %arg5: memref<16x128xf32, #tpu.memory_space<vmem>>, %arg6: memref<16x128xf32, #tpu.memory_space<vmem>>) attributes {dimension_semantics = [#tpu.dimension_semantics<parallel>, #tpu.dimension_semantics<parallel>, #tpu.dimension_semantics<arbitrary>], iteration_bounds = array<i64: 1, 1, 1>, scalar_prefetch = 0 : i64, scratch_operands = 1 : i64, tpu.core_type = #tpu.core_type<tc>, window_params = [{transform_indices = @transform_0, window_bounds = array<i64: 16, 16>}, {transform_indices = @transform_1, window_bounds = array<i64: 16, 128>}, {transform_indices = @transform_2, window_bounds = array<i64: 16, 128>}]} {
    %c0_i32 = arith.constant 0 : i32
    %0 = arith.cmpi eq, %arg2, %c0_i32 : i32
    %1 = arith.extui %0 : i1 to i32
    %c0_i32_0 = arith.constant 0 : i32
    %2 = arith.cmpi ne, %1, %c0_i32_0 : i32
    scf.if %2 {
      %cst_10 = arith.constant 0.000000e+00 : f32
      %12 = vector.broadcast %cst_10 : f32 to vector<16x128xf32>
      %c0_11 = arith.constant 0 : index
      %c0_12 = arith.constant 0 : index
      %13 = vector.load %arg6[%c0_11, %c0_12] : memref<16x128xf32, #tpu.memory_space<vmem>>, vector<16x128xf32>
      tpu.vector_store %arg6[%c0_11, %c0_12], %12 {strides = array<i32>} : memref<16x128xf32, #tpu.memory_space<vmem>>, vector<16x128xf32>,
    } else {
    }
    %c0 = arith.constant 0 : index
    %c0_1 = arith.constant 0 : index
    %3 = vector.load %arg6[%c0, %c0_1] : memref<16x128xf32, #tpu.memory_space<vmem>>, vector<16x128xf32>
    %c0_2 = arith.constant 0 : index
    %c0_3 = arith.constant 0 : index
    %4 = vector.load %arg3[%c0_2, %c0_3] : memref<16x16xf32, #tpu.memory_space<vmem>>, vector<16x16xf32>
    %c0_4 = arith.constant 0 : index
    %c0_5 = arith.constant 0 : index
    %5 = vector.load %arg4[%c0_4, %c0_5] : memref<16x128xf32, #tpu.memory_space<vmem>>, vector<16x128xf32>
    %cst = arith.constant dense<0.000000e+00> : vector<16x128xf32>
    %6 = tpu.matmul %4, %5, %cst {dimension_numbers = #tpu.dot_dimension_numbers<[1], [0], [0], [1], [0, 0, 1, 1], [], []>} : vector<16x16xf32>, vector<16x128xf32>, vector<16x128xf32> -> vector<16x128xf32>
    %7 = arith.addf %3, %6 : vector<16x128xf32>
    %c0_6 = arith.constant 0 : index
    %c0_7 = arith.constant 0 : index
    %8 = vector.load %arg6[%c0_6, %c0_7] : memref<16x128xf32, #tpu.memory_space<vmem>>, vector<16x128xf32>
    tpu.vector_store %arg6[%c0_6, %c0_7], %7 {strides = array<i32>} : memref<16x128xf32, #tpu.memory_space<vmem>>, vector<16x128xf32>,
    %c0_i32_8 = arith.constant 0 : i32
    %9 = arith.cmpi eq, %arg2, %c0_i32_8 : i32
    %10 = arith.extui %9 : i1 to i32
    %c0_i32_9 = arith.constant 0 : i32
    %11 = arith.cmpi ne, %10, %c0_i32_9 : i32
    scf.if %11 {
      %c0_10 = arith.constant 0 : index
      %c0_11 = arith.constant 0 : index
      %12 = vector.load %arg6[%c0_10, %c0_11] : memref<16x128xf32, #tpu.memory_space<vmem>>, vector<16x128xf32>
      %c0_12 = arith.constant 0 : index
      %c0_13 = arith.constant 0 : index
      %13 = vector.load %arg5[%c0_12, %c0_13] : memref<16x128xf32, #tpu.memory_space<vmem>>, vector<16x128xf32>
      tpu.vector_store %arg5[%c0_12, %c0_13], %12 {strides = array<i32>} : memref<16x128xf32, #tpu.memory_space<vmem>>, vector<16x128xf32>,
    } else {
    }
    return
  }
  func.func @transform_0(%arg0: i32, %arg1: i32, %arg2: i32) -> (i32, i32) {
    %c0_i32 = arith.constant 0 : i32
    return %arg1, %arg2 : i32, i32
  }
  func.func @transform_1(%arg0: i32, %arg1: i32, %arg2: i32) -> (i32, i32) {
    %c0_i32 = arith.constant 0 : i32
    return %arg2, %arg0 : i32, i32
  }
  func.func @transform_2(%arg0: i32, %arg1: i32, %arg2: i32) -> (i32, i32) {
    %c0_i32 = arith.constant 0 : i32
    return %arg1, %arg0 : i32, i32
  }
}

</mosaic_0001>

<bundles_post_ra>
// kernel: tpu_custom_call.1
= control target key start
LH: loop header
LB: loop body
LE: loop exit
PB: predicated region body
PF: predicated region fallthrough
CT: control target
= control target key end

     0   :  { %7 = vsyncpa [#allocation4], 0  ;;  %s285_s0 = inlined_call_operand.hbm [shape: f32[16,16], index: 0, kind: input, shape index: {}]   ;;  %s286_s1 = inlined_call_operand.hbm [shape: f32[16,128], index: 1, kind: input, shape index: {}]   ;;  %s287_s2 = inlined_call_operand.hbm [shape: f32[16,128], index: 2, kind: output, shape index: {}]  }
   0x1   :  { %8 = vsyncpa [#allocation7], 0 }
   0x2   :  { %9 = vsyncpa [#allocation5], 0  ;;  %s247_s9 = smov [#allocation3]  }
   0x3   :  { %s15_s10 = sshll.u32 %s247_s9, 4  ;;  %s16_s10 = int_to_ptr.vmem [resolvable:$true] %s15_s10 }
   0x4   :  { %s189_s11 = scalar_lea.vmem %s16_s10, 256  ;;  %p194_p1 = scmp.lt.s32.totalorder %s16_s10, %s16_s10 }
   0x5   :  { %p190_p0 = scmp.ne.s32.totalorder %s16_s10, %s189_s11  ;;  %p195_p2 = scmp.lt.s32.totalorder %s189_s11, %s189_s11 }
   0x7   :  { %p196_p3 = por %p195_p2, %p194_p1 }
   0x9   :  { %p197_p4 = pnand %p196_p3, %p190_p0 }
   0xb   :  { %200 = shalt.err (!%p197_p4)
}
   0xc   :  { %s248_s12 = smov 128   ;;  %s249_s13 = smov 8  }
   0xd   :  { %21 = dma.hbm_to_vmem [thread:$0]  %s285_s0, 256, %s16_s10, [#allocation4], %s248_s12, %s248_s12, %s249_s13  }
   0xe   :  { %s250_s16 = smov [#allocation6]  }
   0xf   :  { %s27_s17 = sshll.u32 %s250_s16, 4  ;;  %s28_s17 = int_to_ptr.vmem [resolvable:$true] %s27_s17 }
  0x10   :  { %s209_s18 = scalar_lea.vmem %s28_s17, 256  ;;  %p214_p6 = scmp.lt.s32.totalorder %s28_s17, %s28_s17 }
  0x11   :  { %p210_p5 = scmp.ne.s32.totalorder %s28_s17, %s209_s18  ;;  %p215_p7 = scmp.lt.s32.totalorder %s209_s18, %s209_s18 }
  0x13   :  { %p216_p8 = por %p215_p7, %p214_p6 }
  0x15   :  { %p217_p9 = pnand %p216_p8, %p210_p5 }
  0x17   :  { %220 = shalt.err (!%p217_p9)
}
  0x18   :  { %33 = dma.hbm_to_vmem [thread:$0]  %s286_s1, 256, %s28_s17, [#allocation7], %s248_s12, %s248_s12, %s249_s13  }
  0x19   :  { %241 = dma.done.wait [#allocation4], 256  }
  0x1a   :  { %242 = vsyncadd [#allocation4], 4294967040 }
  0x1b   :  { %243 = dma.done.wait [#allocation7], 256  }
  0x1c   :  { %244 = vsyncadd [#allocation7], 4294967040  ;;  %vm52_vm0 = vcmask 130048   ;;  %v51_v0 = vld [vmem:[#allocation6 + $0x8] sm:$0xff]  ;;  %v50_v1 = vld [vmem:[#allocation6] sm:$0xff]  ;;  %s251_s0 = smov [#allocation8]  }
  0x1d   :  { %v48_v2 = vld [vmem:[#allocation3] sm:$0xff]  ;;  %169 = vmatprep.subr.mxu0 %v51_v0  ;;  %v49_v3 = vld [vmem:[#allocation3 + $0x8] sm:$0xff]  ;;  %s150_s21 = sshll.u32 %s251_s0, 4  ;;  %s151_s21 = int_to_ptr.vmem [resolvable:$true] %s150_s21 }
  0x1e   :  { %173 = vmatprep.mubr.msk.f32.mxu0 %vm52_vm0, %v48_v2  ;;  %170 = vmatpush3.msra.mxu0 %v51_v0  ;;  %s221_s1 = scalar_lea.vmem %s151_s21, 256  ;;  %p226_p11 = scmp.lt.s32.totalorder %s151_s21, %s151_s21 }
  0x1f   :  { %171 = vmatprep.subr.mxu0 %v50_v1  ;;  %p222_p10 = scmp.ne.s32.totalorder %s151_s21, %s221_s1  ;;  %p227_p12 = scmp.lt.s32.totalorder %s221_s1, %s221_s1 }
  0x20   :  { %172 = vmatpush3.msra.mxu0 %v50_v1 }
  0x21   :  { %174 = vmatmul.mubr.msk.f32.vlgmr.msra.gmra.mxu0 %vm52_vm0, %v49_v3  ;;  %p228_p13 = por %p227_p12, %p226_p11 }
  0x23   :  { %p229_p0 = pnand %p228_p13, %p222_p10 }
  0xe1   :  { %v175_v4 = vpop.f32.mrf.mxu0 }
  0xe2   :  { %144 = vst [vmem:[#allocation8 + $0x8] sm:$0xff] %v175_v4 }
  0xe3   :  { %v125_v5 = vpop.f32.mrf.mxu0 }
  0xe4   :  { %143 = vst [vmem:[#allocation8] sm:$0xff] %v125_v5 }
  0xe5   :  { %232 = shalt.err (!%p229_p0)
}
  0xe6   :  { %156 = dma.vmem_to_hbm [thread:$0]  %s151_s21, 256, %s287_s2, [#allocation5], %s248_s12, %s248_s12, %s249_s13  }
  0xe7   :  { %245 = dma.done.wait [#allocation5], 256  }
  0xe8   :  { %246 = vsyncadd [#allocation5], 4294967040 }
  0xe9   :  { %160 = vsyncpa [#allocation4], 1 }
  0xea   :  { %161 = vsyncpa [#allocation7], 1 }
  0xeb   :  { %162 = vsyncpa [#allocation5], 1 }

</bundles_post_ra>
